<compile_context>
chip_gen: v7x
topology: tpu7x:2x2x1
jax: 0.10.0
libtpu: 0.0.40
codegen_flags: <defaults>
</compile_context>

<pallas_src>
import math

import jax
import jax.numpy as jnp
from jax.experimental import pallas as pl
from jax.experimental.pallas import tpu as pltpu


def _round_up(x, m):
    return ((x + m - 1) // m) * m


def _balanced_tile(dim, align, cap):
    """Multiple-of-`align` tile <= cap that splits `dim` with minimal padding."""
    d = _round_up(max(dim, align), align)
    n_blocks = -(-d // cap)            # cdiv
    return _round_up(-(-d // n_blocks), align)


def _pick_tn(n, cap, want_multi):
    """Lane-dense (multiple of 128) output tile.  Prefers >= 2 N blocks when
    `want_multi` (megacore sharding on v7x when the batch grid has a single
    block), then minimal N padding, then the largest tile."""
    n0 = _round_up(max(n, 128), 128)
    best = None
    for tn in range(128, min(cap, n0) + 1, 128):
        np_ = _round_up(n0, tn)
        blocks = np_ // tn
        multi_miss = 1 if (want_multi and blocks < 2) else 0
        key = (multi_miss, np_, -tn)
        if best is None or key < best[0]:
            best = (key, tn)
    return best[1]


def _mofnet_kernel(x_ref, w_ref, adjt_ref, b_ref, o_ref, acc_ref):
    # x_ref    : (tm, tk)
    # w_ref    : (tn, tk)   weight tile, native (out, in) layout — never transposed
    # adjt_ref : (tn, tk)   int8 mask tile, pre-transposed in the wrapper
    # b_ref    : (1,  tn)   f32 bias tile
    # o_ref    : (tm, tn)
    # acc_ref  : (tm, tn)   f32 scratch, resident across the K grid axis
    k = pl.program_id(2)

    @pl.when(k == 0)
    def _init():
        acc_ref[...] = jnp.zeros_like(acc_ref)

    # Single VPU select applies the mask in the weight's native layout; the MXU
    # consumes it as an NT contraction (contract dim 1 of both operands).
    masked = jnp.where(adjt_ref[...] != 0, w_ref[...], 0)
    acc_ref[...] += jax.lax.dot_general(
        x_ref[...], masked,
        dimension_numbers=(((1,), (1,)), ((), ())),
        preferred_element_type=jnp.float32)

    @pl.when(k == pl.num_programs(2) - 1)
    def _finalize():
        o_ref[...] = (acc_ref[...] + b_ref[...].astype(jnp.float32)
                      ).astype(o_ref.dtype)


def mofnet_layer(x, weight, adj, bias=None, *, tm=None, tn=None, tk=None,
                 compute_dtype=None):
    """x: (B, in_dims), weight: (out_dims, in_dims), adj: (in_dims, out_dims),
    bias: (out_dims,) or None.  Returns (B, out_dims) with x's dtype."""
    B, K = x.shape
    N = weight.shape[0]
    assert weight.shape == (N, K), "weight must be (out_dims, in_dims)"
    assert adj.shape == (K, N), "adj must be (in_dims, out_dims)"

    out_dtype = x.dtype

    # Keep the mask compact and avoid awkward i1 layouts: bool -> int8.
    if adj.dtype == jnp.bool_:
        adj = adj.astype(jnp.int8)
    # One-time transpose of the (small, usually static) mask so the kernel can
    # mask in the weight's native (out, in) layout.
    adjt = adj.T                                        # (N, K)

    if compute_dtype is not None:
        # TODO(synk): persist the weight as bf16 at the parameter level to also
        # halve the weight HBM stream; casting here mainly buys MXU rate.
        x = x.astype(compute_dtype)
        weight = weight.astype(compute_dtype)

    # ---- tile selection --------------------------------------------------
    tm = tm or _balanced_tile(B, 8, 512)
    tk = tk or _balanced_tile(K, 128, 512)
    Bp = _round_up(max(B, 8), tm)
    grid_i = Bp // tm
    tn = tn or _pick_tn(N, cap=512, want_multi=(grid_i == 1))
    Kp = _round_up(K, tk)
    Np = _round_up(N, tn)

    # Zero padding is exact: padded K columns contribute 0 to the dot product,
    # padded M rows / N columns are sliced off below.
    xp = x if (Bp, Kp) == (B, K) else jnp.pad(x, ((0, Bp - B), (0, Kp - K)))
    wp = weight if (Np, Kp) == (N, K) else jnp.pad(weight,
                                                   ((0, Np - N), (0, Kp - K)))
    ap = adjt if (Np, Kp) == (N, K) else jnp.pad(adjt,
                                                 ((0, Np - N), (0, Kp - K)))
    if bias is None:
        bp = jnp.zeros((1, Np), jnp.float32)
    else:
        bp = jnp.pad(bias.astype(jnp.float32), (0, Np - N)).reshape(1, Np)

    grid = (Bp // tm, Np // tn, Kp // tk)

    # Advisory cost estimate (weight/adj re-streamed per i block, x per j block).
    bytes_accessed = (xp.size * xp.dtype.itemsize * (Np // tn)
                      + wp.size * wp.dtype.itemsize * (Bp // tm)
                      + ap.size * ap.dtype.itemsize * (Bp // tm)
                      + bp.size * bp.dtype.itemsize
                      + Bp * Np * jnp.dtype(out_dtype).itemsize)

    out_padded = pl.pallas_call(
        _mofnet_kernel,
        out_shape=jax.ShapeDtypeStruct((Bp, Np), out_dtype),
        grid_spec=pltpu.PrefetchScalarGridSpec(
            num_scalar_prefetch=0,
            grid=grid,
            in_specs=[
                pl.BlockSpec((tm, tk), lambda i, j, k: (i, k)),   # x
                pl.BlockSpec((tn, tk), lambda i, j, k: (j, k)),   # weight (out, in)
                pl.BlockSpec((tn, tk), lambda i, j, k: (j, k)),   # adj.T  (out, in)
                pl.BlockSpec((1, tn), lambda i, j, k: (0, j)),    # bias
            ],
            out_specs=pl.BlockSpec((tm, tn), lambda i, j, k: (i, j)),
            scratch_shapes=[pltpu.VMEM((tm, tn), jnp.float32)],
        ),
        compiler_params=pltpu.CompilerParams(
            dimension_semantics=("parallel", "parallel", "arbitrary")),
        cost_estimate=pl.CostEstimate(
            flops=2 * Bp * Kp * Np,
            transcendentals=0,
            bytes_accessed=bytes_accessed),
    )(xp, wp, ap, bp)

    if (Bp, Np) == (B, N):
        return out_padded
    return out_padded[:B, :N]


def init_params(key, in_dims, out_dims):
    """Mimics PyTorch reset_parameters(): kaiming_uniform_(a=sqrt(5)) weight,
    U(-1/sqrt(fan_in), 1/sqrt(fan_in)) bias."""
    kw, kb = jax.random.split(key)
    bound = 1.0 / math.sqrt(in_dims)
    weight = jax.random.uniform(kw, (out_dims, in_dims), jnp.float32,
                                minval=-bound, maxval=bound)
    bias = jax.random.uniform(kb, (out_dims,), jnp.float32,
                              minval=-bound, maxval=bound)
    return weight, bias


if __name__ == "__main__":
    key = jax.random.PRNGKey(0)
    k_x, k_adj, k_p = jax.random.split(key, 3)

    # Small but tiling-exercising shapes: 2 K-tiles, multiple N-tiles.
    batch, in_dims, out_dims = 16, 1024, 384

    x = jax.random.normal(k_x, (batch, in_dims), jnp.float32)
    adj_f32 = (jax.random.uniform(k_adj, (in_dims, out_dims)) > 0.5
               ).astype(jnp.float32)
    # Binary mask stored compactly as int8 -> 4x less mask HBM traffic; the
    # kernel masks via a select, no cast/multiply.
    adj_i8 = adj_f32.astype(jnp.int8)
    weight, bias = init_params(k_p, in_dims, out_dims)

    fwd = jax.jit(mofnet_layer)
    out = jax.block_until_ready(fwd(x, weight, adj_i8, bias))

    # Pure-JAX reference of the PyTorch forward semantics.
    ref = jnp.dot(x, weight.T * adj_f32,
                  precision=jax.lax.Precision.HIGHEST) + bias

    assert out.shape == (batch, out_dims)
    assert jnp.allclose(out, ref, atol=5e-4, rtol=5e-4), "mismatch vs reference"

    print("KERNEL_OK")
</pallas_src>

<mosaic_0001>
module attributes {stable_mosaic.version = 11 : i64} {
  func.func @_mofnet_kernel(%arg0: i32, %arg1: i32, %arg2: i32, %arg3: memref<16x512xf32, #tpu.memory_space<vmem>>, %arg4: memref<128x512xf32, #tpu.memory_space<vmem>>, %arg5: memref<128x512xi8, #tpu.memory_space<vmem>>, %arg6: memref<1x128xf32, #tpu.memory_space<vmem>>, %arg7: memref<16x128xf32, #tpu.memory_space<vmem>>, %arg8: memref<16x128xf32, #tpu.memory_space<vmem>>) attributes {dimension_semantics = [#tpu.dimension_semantics<parallel>, #tpu.dimension_semantics<parallel>, #tpu.dimension_semantics<arbitrary>], iteration_bounds = array<i64: 1, 3, 2>, scalar_prefetch = 0 : i64, scratch_operands = 1 : i64, tpu.core_type = #tpu.core_type<tc>, window_params = [{transform_indices = @transform_0, window_bounds = array<i64: 16, 512>}, {transform_indices = @transform_1, window_bounds = array<i64: 128, 512>}, {transform_indices = @transform_2, window_bounds = array<i64: 128, 512>}, {transform_indices = @transform_3, window_bounds = array<i64: 1, 128>}, {transform_indices = @transform_4, window_bounds = array<i64: 16, 128>}]} {
    %c0_i32 = arith.constant 0 : i32
    %0 = arith.cmpi eq, %arg2, %c0_i32 : i32
    %1 = arith.extui %0 : i1 to i32
    %c0_i32_0 = arith.constant 0 : i32
    %2 = arith.cmpi ne, %1, %c0_i32_0 : i32
    scf.if %2 {
      %cst_12 = arith.constant 0.000000e+00 : f32
      %18 = vector.broadcast %cst_12 : f32 to vector<16x128xf32>
      %c0_13 = arith.constant 0 : index
      %c0_14 = arith.constant 0 : index
      %19 = vector.load %arg8[%c0_13, %c0_14] : memref<16x128xf32, #tpu.memory_space<vmem>>, vector<16x128xf32>
      tpu.vector_store %arg8[%c0_13, %c0_14], %18 {strides = array<i32>} : memref<16x128xf32, #tpu.memory_space<vmem>>, vector<16x128xf32>,
    } else {
    }
    %c0 = arith.constant 0 : index
    %c0_1 = arith.constant 0 : index
    %3 = vector.load %arg5[%c0, %c0_1] : memref<128x512xi8, #tpu.memory_space<vmem>>, vector<128x512xi8>
    %c0_i8 = arith.constant 0 : i8
    %4 = vector.broadcast %c0_i8 : i8 to vector<128x512xi8>
    %5 = arith.cmpi ne, %3, %4 : vector<128x512xi8>
    %c0_2 = arith.constant 0 : index
    %c0_3 = arith.constant 0 : index
    %6 = vector.load %arg4[%c0_2, %c0_3] : memref<128x512xf32, #tpu.memory_space<vmem>>, vector<128x512xf32>
    %c0_i32_4 = arith.constant 0 : i32
    %7 = arith.sitofp %c0_i32_4 : i32 to f32
    %8 = vector.broadcast %7 : f32 to vector<128x512xf32>
    %9 = arith.select %5, %6, %8 : vector<128x512xi1>, vector<128x512xf32>
    %c0_5 = arith.constant 0 : index
    %c0_6 = arith.constant 0 : index
    %10 = vector.load %arg8[%c0_5, %c0_6] : memref<16x128xf32, #tpu.memory_space<vmem>>, vector<16x128xf32>
    %c0_7 = arith.constant 0 : index
    %c0_8 = arith.constant 0 : index
    %11 = vector.load %arg3[%c0_7, %c0_8] : memref<16x512xf32, #tpu.memory_space<vmem>>, vector<16x512xf32>
    %cst = arith.constant dense<0.000000e+00> : vector<16x128xf32>
    %12 = tpu.matmul %11, %9, %cst {dimension_numbers = #tpu.dot_dimension_numbers<[1], [1], [0], [0], [0, 0, 1, 0], [], []>} : vector<16x512xf32>, vector<128x512xf32>, vector<16x128xf32> -> vector<16x128xf32>
    %13 = arith.addf %10, %12 : vector<16x128xf32>
    %c0_9 = arith.constant 0 : index
    %c0_10 = arith.constant 0 : index
    %14 = vector.load %arg8[%c0_9, %c0_10] : memref<16x128xf32, #tpu.memory_space<vmem>>, vector<16x128xf32>
    tpu.vector_store %arg8[%c0_9, %c0_10], %13 {strides = array<i32>} : memref<16x128xf32, #tpu.memory_space<vmem>>, vector<16x128xf32>,
    %c1_i32 = arith.constant 1 : i32
    %15 = arith.cmpi eq, %arg2, %c1_i32 : i32
    %16 = arith.extui %15 : i1 to i32
    %c0_i32_11 = arith.constant 0 : i32
    %17 = arith.cmpi ne, %16, %c0_i32_11 : i32
    scf.if %17 {
      %c0_12 = arith.constant 0 : index
      %c0_13 = arith.constant 0 : index
      %18 = vector.load %arg8[%c0_12, %c0_13] : memref<16x128xf32, #tpu.memory_space<vmem>>, vector<16x128xf32>
      %c0_14 = arith.constant 0 : index
      %c0_15 = arith.constant 0 : index
      %19 = vector.load %arg6[%c0_14, %c0_15] : memref<1x128xf32, #tpu.memory_space<vmem>>, vector<1x128xf32>
      %20 = vector.broadcast %19 : vector<1x128xf32> to vector<16x128xf32>
      %21 = arith.addf %18, %20 : vector<16x128xf32>
      %c0_16 = arith.constant 0 : index
      %c0_17 = arith.constant 0 : index
      %22 = vector.load %arg7[%c0_16, %c0_17] : memref<16x128xf32, #tpu.memory_space<vmem>>, vector<16x128xf32>
      tpu.vector_store %arg7[%c0_16, %c0_17], %21 {strides = array<i32>} : memref<16x128xf32, #tpu.memory_space<vmem>>, vector<16x128xf32>,
    } else {
    }
    return
  }
  func.func @transform_0(%arg0: i32, %arg1: i32, %arg2: i32) -> (i32, i32) {
    %c0_i32 = arith.constant 0 : i32
    return %arg0, %arg2 : i32, i32
  }
  func.func @transform_1(%arg0: i32, %arg1: i32, %arg2: i32) -> (i32, i32) {
    %c0_i32 = arith.constant 0 : i32
    return %arg1, %arg2 : i32, i32
  }
  func.func @transform_2(%arg0: i32, %arg1: i32, %arg2: i32) -> (i32, i32) {
    %c0_i32 = arith.constant 0 : i32
    return %arg1, %arg2 : i32, i32
  }
  func.func @transform_3(%arg0: i32, %arg1: i32, %arg2: i32) -> (i32, i32) {
    %c0_i32 = arith.constant 0 : i32
    %c0_i32_0 = arith.constant 0 : i32
    return %c0_i32, %arg1 : i32, i32
  }
  func.func @transform_4(%arg0: i32, %arg1: i32, %arg2: i32) -> (i32, i32) {
    %c0_i32 = arith.constant 0 : i32
    return %arg0, %arg1 : i32, i32
  }
}

</mosaic_0001>

<bundles_post_ra>
// kernel: mofnet_layer.1
= control target key start
LH: loop header
LB: loop body
LE: loop exit
PB: predicated region body
PF: predicated region fallthrough
CT: control target
= control target key end

     0   :  { %s2761_s0 = inlined_call_operand.hbm [shape: f32[16,1024], index: 0, kind: input, shape index: {}]   ;;  %s2762_s1 = inlined_call_operand.hbm [shape: f32[384,1024], index: 1, kind: input, shape index: {}]   ;;  %s2763_s2 = inlined_call_operand.vmem [shape: s8[384,1024], index: 2, kind: input, shape index: {}]   ;;  %s2764_s3 = inlined_call_operand.vmem [shape: f32[1,384], index: 3, kind: input, shape index: {}]   ;;  %s2765_s4 = inlined_call_operand.hbm [shape: f32[16,384], index: 4, kind: output, shape index: {}]  }
   0x1   :  { %2780 = sst [smem:[#allocation25_spill]] %s2761_s0 }
   0x2   :  { %2781 = sst [smem:[#allocation26_spill]] %s2765_s4 }
   0x3   :  { %9 = vsyncpa [#allocation4], 0 }
   0x4   :  { %11 = vsyncpa [#allocation4 + $0x1], 0 }
   0x5   :  { %12 = vsyncpa [#allocation7], 0 }
   0x6   :  { %14 = vsyncpa [#allocation7 + $0x1], 0 }
   0x7   :  { %15 = vsyncpa [#allocation5], 0 }
   0x8   :  { %17 = vsyncpa [#allocation5 + $0x1], 0  ;;  %s1751_s15 = smov 0   ;;  %s1753_s16 = smov 0  }
   0x9   :  { %s1755_s17 = smov 0   ;;  %s1757_s18 = smov 0  }
   0xa   :  { %s1759_s19 = smov 0   ;;  %s1761_s20 = smov 0  }
   0xb   :  { %s1763_s21 = smov 0   ;;  %s1765_s22 = smov 0  }
   0xc   :  { %s1767_s23 = smov 0   ;;  %s1769_s24 = smov 0  }
   0xd   :  { %s1771_s25 = smov 0   ;;  %s1773_s26 = smov 0  }
   0xe   :  { %s1775_s27 = smov 0   ;;  %s1777_s28 = smov 0  }
   0xf LB: > { %2782 = sst [smem:[#allocation13_spill]] %s1661_s15  ;;  %s2766_s29 = sadd.s32 4294967295, %s1713_s28   ;;  %s1713_s28 = sphi %s1777_s28, %s23_s28   ;;  %s1709_s27 = sphi %s1775_s27, %s2922_s27   ;;  %s1705_s26 = sphi %s1773_s26, %s2921_s26   ;;  %s1701_s25 = sphi %s1771_s25, %s2920_s25   ;;  %s1697_s24 = sphi %s1769_s24, %s2919_s24   ;;  %s1693_s23 = sphi %s1767_s23, %s2908_s23   ;;  %s1689_s22 = sphi %s1765_s22, %s2918_s22   ;;  %s1685_s21 = sphi %s1763_s21, %s2917_s21   ;;  %s1681_s20 = sphi %s1761_s20, %s2916_s20   ;;  %s1677_s19 = sphi %s1759_s19, %s2915_s19   ;;  %s1673_s18 = sphi %s1757_s18, %s2914_s18   ;;  %s1669_s17 = sphi %s1755_s17, %s2904_s17   ;;  %s1665_s16 = sphi %s1753_s16, %s2913_s16   ;;  %s1661_s15 = sphi %s1751_s15, %s2912_s15  }
  0x10   : > { %2783 = sst [smem:[#allocation14_spill]] %s1669_s17  ;;  %s35_s5 = sadd.s32 1, %s1705_s26 }
  0x11   : > { %2784 = sst [smem:[#allocation15_spill]] %s1681_s20  ;;  %s38_s6 = sadd.s32 1, %s1709_s27 }
  0x12   : > { %2785 = sst [smem:[#allocation16_spill]] %s1693_s23  ;;  %p36_p0 = scmp.ge.s32.totalorder %s35_s5, 2 }
  0x13   : > { %2786 = sst [smem:[#allocation17_spill]] %s1697_s24  ;;  %s51_s7 = sadd.s32 1, %s1693_s23 }
  0x14   : > { %p58_p1 = scmp.ne.s32.totalorder %s1693_s23, %s1689_s22  ;;  %p59_p2 = scmp.eq.s32.totalorder %s1713_s28, 0 }
  0x15   : > { %s2924_s5 = smov (%p36_p0, %s35_s5), 0  ;;  %s2926_s6 = smov (!%p36_p0, %s38_s6), %s1709_s27 }
  0x16   : > { %2787 = sst [smem:[#allocation18_spill]] %s2924_s5  ;;  %s47_s8 = ssub.s32 %s1705_s26, %s2924_s5 }
  0x17   : > { %p1834_p3 = por %p59_p2, %p58_p1  ;;  %p40_p4 = scmp.ge.s32.totalorder %s2926_s6, 3 }
  0x18   : > { %p49_p5 = scmp.eq.s32.totalorder %s47_s8, 0  ;;  %p64_p6 = scmp.ne.s32.totalorder %s1689_s22, %s1685_s21 }
  0x19   : > { %p1841_p7 = scmp.eq.s32.totalorder %s2766_s29, 0  ;;  %s2928_s6 = smov (%p40_p4, %s2926_s6), 0 }
  0x1a   : > { %2790 = sst [smem:[#allocation19_spill]] %s2928_s6  ;;  %s74_s13 = ssub.s32 %s1709_s27, %s2928_s6 }
  0x1b   : > { %s1848_s11 = scalar_select %p49_p5, %s1693_s23, %s51_s7  }
  0x1c   : > { %p1852_p8 = por %p1841_p7, %p64_p6  ;;  %s76_s14 = sor.u32 %s74_s13, %s47_s8 }
  0x1d   : > { %2791 = sst [smem:[#allocation20_spill]] %s1848_s11  ;;  %s79_s21 = sadd.s32 1, %s1681_s20 }
  0x1e   : > { %s2792_s12 = scalar_select %p1852_p8, 1, 0 }
  0x1f   : > { %p77_p9 = scmp.eq.s32.totalorder %s76_s14, 0  ;;  %p86_p10 = scmp.ne.s32.totalorder %s1681_s20, %s1677_s19 }
  0x20   : > { %p92_p11 = scmp.ne.s32.totalorder %s1677_s19, %s1673_s18  ;;  %p159_p12 = scmp.eq.s32.totalorder %s74_s13, 0 }
  0x21   : > { %s1864_s30 = scalar_select %p77_p9, %s1681_s20, %s79_s21  }
  0x22   : > { %p1868_p13 = por %p86_p10, %p59_p2  ;;  %p1874_p0 = por %p92_p11, %p1841_p7 }
  0x23   : > { %2793 = sst [smem:[#allocation21_spill]] %s1864_s30  ;;  %s161_s5 = sadd.s32 1, %s1669_s17 }
  0x24   : > { %s2795_s29 = scalar_select %p1874_p0, 1, 0 }
  0x25   : > { %p171_p1 = scmp.ne.s32.totalorder %s1669_s17, %s1665_s16  ;;  %s2797_s14 = sadd.s32 4294967295, %s1713_s28  }
  0x26   : > { %s1882_s8 = scalar_select %p159_p12, %s1669_s17, %s161_s5  }
  0x27   : > { %p172_p4 = scmp.eq.s32.totalorder %s2797_s14, 5  ;;  %p177_p5 = scmp.ne.s32.totalorder %s1665_s16, %s1661_s15 }
  0x28   : > { %2796 = sst [smem:[#allocation22_spill]] %s1882_s8  ;;  %s2798_s18 = sadd.s32 4294967294, %s1713_s28  }
  0x29   : > { %p178_p6 = scmp.eq.s32.totalorder %s2798_s18, 5  ;;  %p1890_p9 = por %p172_p4, %p171_p1 }
  0x2a   : > { %p1187_p7 = scmp.ge.s32.totalorder %s1713_s28, 6 }
  0x2b   : > { %s2799_s13 = scalar_select %p1890_p9, 1, 0 }
  0x2c   : > { %p1894_p2 = por %p178_p6, %p177_p5  ;;  %194 = sbr.rel (%p1187_p7) target bundleno = 118 (0x76), region = 16 }
  0x2d   : > { %2800 = sst [smem:[#allocation23_spill]] %s2799_s13  ;;  %s198_s5 = sand.u32 (!%p1187_p7), 1, %s1693_s23  }
  0x2e   : > { %s2801_s21 = scalar_select %p1894_p2, 1, 0 }
  0x2f   : > { %s1277_s10 = sshll.u32 (!%p1187_p7), %s1705_s26, 9  ;;  %s1188_s14 = sshll.u32 (!%p1187_p7), %s198_s5, 6 }
  0x30   : > { %2802 = sst [smem:[#allocation24_spill]] %s2801_s21  ;;  %s2803_s0 = sld [smem:[#allocation25_spill]] (!%p1187_p7) }
  0x31   : > { %s202_s30 = scalar_lea.vmem (!%p1187_p7), [#allocation3], %s1188_s14  ;;  %s1909_s17 = sand.u32 (!%p1187_p7), 1, %s1681_s20  }
  0x32   : > { %s212_s8 = sshll.u32 (!%p1187_p7), %s202_s30, 4  ;;  %s1911_s21 = scalar_lea.sflag (!%p1187_p7), [#allocation4], %s198_s5  ;;  %s1906_s8 = int_to_ptr.vmem [resolvable:$true] %s212_s8 }
  0x36   : > { %s1904_s11 = scalar_lea.hbm %s2803_s0, %s1277_s10  ;;  %s1511_s18 = scalar_lea.hbm %s2803_s0, 2048 }
  0x37   : > { %s1507_s23 = scalar_lea.hbm %s1904_s11, 1024  ;;  %p1512_p1 = scmp.lt.u32.totalorder %s1904_s11, %s2803_s0 }
  0x38   : > { %p1508_p10 = scmp.ne.s32.totalorder %s1904_s11, %s1507_s23  ;;  %p1513_p4 = scmp.lt.u32.totalorder %s1511_s18, %s1507_s23 }
  0x39   : > { %p1515_p6 = scmp.lt.u32.totalorder %s1507_s23, %s1904_s11 }
  0x3a   : > { %p1509_p11 = pnand %p1508_p10, %p1834_p3  ;;  %p1514_p5 = por %p1513_p4, %p1512_p1 }
  0x3c   : > { %p1510_p12 = pneg %p1509_p11  ;;  %p1516_p7 = por %p1515_p6, %p1514_p5 }
  0x3e   : > { %p1517_p2 = pnand %p1516_p7, %p1510_p12 }
  0x40   : > { %1520 = shalt.err (!%p1517_p2)
}
  0x41   : > { %s1521_s30 = scalar_lea.vmem %s1906_s8, 1024  ;;  %s1715_s5 = smov [#allocation3]  }
  0x42   : > { %p1522_p10 = scmp.ne.s32.totalorder %s1906_s8, %s1521_s30  ;;  %s1525_s14 = sshll.u32 %s1715_s5, 4  ;;  %s1526_s14 = int_to_ptr.vmem [resolvable:$false] %s1525_s14 }
  0x43   : > { %s1527_s4 = scalar_lea.vmem %s1526_s14, 2048  ;;  %p1528_p0 = scmp.lt.s32.totalorder %s1906_s8, %s1526_s14 }
  0x44   : > { %p1523_p11 = pnand %p1522_p10, %p1834_p3  ;;  %p1529_p8 = scmp.lt.s32.totalorder %s1527_s4, %s1521_s30 }
  0x46   : > { %p1524_p9 = pneg %p1523_p11  ;;  %p1530_p1 = por %p1529_p8, %p1528_p0 }
  0x48   : > { %p1531_p4 = pnand %p1530_p1, %p1524_p9 }
  0x4a   : > { %1534 = shalt.err (!%p1531_p4)
}
  0x4b   : > { %s1716_s15 = smov 1024   ;;  %s1717_s23 = smov 512  }
  0x4c   : > { %s1718_s6 = smov 32   ;;  %s1191_s10 = sshll.u32 %s1909_s17, 9 }
  0x4d   : > { %1376 = dma.hbm_to_vmem [thread:$0]  (%p1834_p3), %s1904_s11, 1024, %s1906_s8, %s1911_s21, %s1716_s15, %s1717_s23, %s1718_s6  }
  0x4e   : > { %s1193_s18 = sshll.u32 %s1705_s26, 2  ;;  %s1278_s30 = sshll.u32 %s1709_s27, 7 }
  0x4f   : > { %s226_s5 = scalar_lea.vmem [#allocation6], %s1191_s10  ;;  %s233_s4 = sadd.s32 %s1278_s30, %s1193_s18 }
  0x50   : > { %s236_s14 = sshll.u32 %s226_s5, 4  ;;  %s1195_s0 = sshll.u32 %s233_s4, 7  ;;  %s1943_s14 = int_to_ptr.vmem [resolvable:$true] %s236_s14 }
  0x51   : > { %s1948_s24 = scalar_lea.hbm %s2762_s1, %s1195_s0  ;;  %s223_s9 = scalar_lea.sflag [#allocation7], %s1909_s17 }
  0x52   : > { %s1535_s11 = scalar_lea.hbm %s1948_s24, 8192  ;;  %s1539_s10 = scalar_lea.hbm %s2762_s1, 49152 }
  0x53   : > { %p1536_p3 = scmp.ne.s32.totalorder %s1948_s24, %s1535_s11  ;;  %p1540_p9 = scmp.lt.u32.totalorder %s1948_s24, %s2762_s1 }
  0x54   : > { %p1541_p2 = scmp.lt.u32.totalorder %s1539_s10, %s1535_s11  ;;  %p1543_p5 = scmp.lt.u32.totalorder %s1535_s11, %s1948_s24 }
  0x55   : > { %p1537_p8 = pnand %p1536_p3, %p1868_p13 }
  0x56   : > { %p1542_p12 = por %p1541_p2, %p1540_p9 }
  0x57   : > { %p1538_p0 = pneg %p1537_p8 }
  0x58   : > { %p1544_p6 = por %p1543_p5, %p1542_p12 }
  0x5a   : > { %p1545_p7 = pnand %p1544_p6, %p1538_p0 }
  0x5c   : > { %1548 = shalt.err (!%p1545_p7)
}
  0x5d   : > { %s1549_s0 = scalar_lea.vmem %s1943_s14, 8192  ;;  %s1719_s20 = smov [#allocation6]  }
  0x5e   : > { %p1550_p10 = scmp.ne.s32.totalorder %s1943_s14, %s1549_s0  ;;  %s1553_s13 = sshll.u32 %s1719_s20, 4  ;;  %s1554_s13 = int_to_ptr.vmem [resolvable:$false] %s1553_s13 }
  0x5f   : > { %s1555_s4 = scalar_lea.vmem %s1554_s13, 16384  ;;  %p1556_p4 = scmp.lt.s32.totalorder %s1943_s14, %s1554_s13 }
  0x60   : > { %p1551_p11 = pnand %p1550_p10, %p1868_p13  ;;  %p1557_p3 = scmp.lt.s32.totalorder %s1555_s4, %s1549_s0 }
  0x62   : > { %p1552_p1 = pneg %p1551_p11  ;;  %p1558_p8 = por %p1557_p3, %p1556_p4 }
  0x64   : > { %p1559_p9 = pnand %p1558_p8, %p1552_p1 }
  0x66   : > { %1562 = shalt.err (!%p1559_p9)
}
  0x67   : > { %1377 = dma.hbm_to_vmem [thread:$0]  (%p1868_p13), %s1948_s24, 8192, %s1943_s14, %s223_s9, %s1716_s15, %s1717_s23, %s1718_s6  }
  0x68   : > { %245 = sbr.rel (!%p1868_p13) target bundleno = 118 (0x76), region = 28  ;;  %s1196_s11 = sshll.u32 (%p1868_p13), %s1909_s17, 7 }
  0x69   : > { %s1279_s8 = sshll.u32 (%p1868_p13), %s1709_s27, 5  ;;  %s249_s17 = scalar_lea.vmem (%p1868_p13), [#allocation8], %s1196_s11 }
  0x6a   : > { %s253_s21 = sadd.s32 (%p1868_p13), %s1279_s8, %s1193_s18 }
  0x6b   : > { %s1200_s10 = sshll.u32 (%p1868_p13), %s253_s21, 3 }
  0x6c   : > { %s1986_s0 = scalar_lea.vmem (%p1868_p13), %s2763_s2, %s1200_s10 }
  0x6d   : > { %v268_v0 = vld [vmem:[%s1986_s0] sm:$0xff] (%p1868_p13)  ;;  %v270_v1 = vld [vmem:[%s1986_s0 + $0x8] sm:$0xff] (%p1868_p13)  ;;  %v272_v2 = vld [vmem:[%s1986_s0 + $0x10] sm:$0xff] (%p1868_p13) }
  0x6e   : > { %269 = vst [vmem:[%s249_s17] sm:$0xff] (%p1868_p13), %v268_v0  ;;  %271 = vst [vmem:[%s249_s17 + $0x8] sm:$0xff] (%p1868_p13), %v270_v1  ;;  %v274_v3 = vld [vmem:[%s1986_s0 + $0x18] sm:$0xff] (%p1868_p13)  ;;  %v276_v4 = vld [vmem:[%s1986_s0 + $0x40] sm:$0xff] (%p1868_p13) }
  0x6f   : > { %273 = vst [vmem:[%s249_s17 + $0x10] sm:$0xff] %v272_v2  ;;  %v278_v5 = vld [vmem:[%s1986_s0 + $0x48] sm:$0xff]  ;;  %275 = vst [vmem:[%s249_s17 + $0x18] sm:$0xff] %v274_v3  ;;  %v280_v6 = vld [vmem:[%s1986_s0 + $0x50] sm:$0xff] }
  0x70   : > { %277 = vst [vmem:[%s249_s17 + $0x20] sm:$0xff] %v276_v4  ;;  %279 = vst [vmem:[%s249_s17 + $0x28] sm:$0xff] %v278_v5  ;;  %v282_v7 = vld [vmem:[%s1986_s0 + $0x58] sm:$0xff]  ;;  %v284_v8 = vld [vmem:[%s1986_s0 + $0x80] sm:$0xff] }
  0x71   : > { %281 = vst [vmem:[%s249_s17 + $0x30] sm:$0xff] %v280_v6  ;;  %283 = vst [vmem:[%s249_s17 + $0x38] sm:$0xff] %v282_v7  ;;  %v286_v9 = vld [vmem:[%s1986_s0 + $0x88] sm:$0xff]  ;;  %v288_v10 = vld [vmem:[%s1986_s0 + $0x90] sm:$0xff] }
  0x72   : > { %285 = vst [vmem:[%s249_s17 + $0x40] sm:$0xff] %v284_v8  ;;  %v290_v11 = vld [vmem:[%s1986_s0 + $0x98] sm:$0xff]  ;;  %287 = vst [vmem:[%s249_s17 + $0x48] sm:$0xff] %v286_v9  ;;  %v292_v12 = vld [vmem:[%s1986_s0 + $0xc0] sm:$0xff] }
  0x73   : > { %289 = vst [vmem:[%s249_s17 + $0x50] sm:$0xff] %v288_v10  ;;  %291 = vst [vmem:[%s249_s17 + $0x58] sm:$0xff] %v290_v11  ;;  %v294_v13 = vld [vmem:[%s1986_s0 + $0xc8] sm:$0xff]  ;;  %v296_v14 = vld [vmem:[%s1986_s0 + $0xd0] sm:$0xff] }
  0x74   : > { %293 = vst [vmem:[%s249_s17 + $0x60] sm:$0xff] %v292_v12  ;;  %295 = vst [vmem:[%s249_s17 + $0x68] sm:$0xff] %v294_v13  ;;  %v298_v15 = vld [vmem:[%s1986_s0 + $0xd8] sm:$0xff] }
  0x75   : > { %297 = vst [vmem:[%s249_s17 + $0x70] sm:$0xff] %v296_v14  ;;  %299 = vst [vmem:[%s249_s17 + $0x78] sm:$0xff] %v298_v15 }
  0x76 PF: > { %p1201_p13 = scmp.ge.s32.totalorder %s1713_s28, 1  ;;  %p310_p0 = scmp.lt.s32.totalorder %s1713_s28, 7 }
  0x78   : > { %p311_p2 = pnand %p1201_p13, %p310_p0 }
  0x79   : > { %s316_s24 = sand.u32 (!%p311_p2), 1, %s1689_s22   ;;  %p2804_p12 = scmp.ne.s32.totalorder (!%p311_p2), %s2792_s12, 0 }
  0x7a   : > { %314 = sbr.rel (%p311_p2) target bundleno = 511 (0x1ff), region = 55  ;;  %s1202_s7 = sshll.u32 (!%p311_p2), %s316_s24, 6 }
  0x7b   : > { %s317_s15 = scalar_lea.sflag (!%p311_p2), [#allocation4], %s316_s24  ;;  %s2007_s23 = scalar_lea.vmem (!%p311_p2), [#allocation3], %s1202_s7 }
  0x81   : > { %1648 = dma.done.wait (%p2804_p12), %s317_s15, 1024  }
  0x82   : > { %1650 = vsyncadd (%p2804_p12), %s317_s15, 4294966272  ;;  %s325_s6 = sand.u32 1, %s1677_s19   ;;  %p2805_p5 = scmp.ne.s32.totalorder %s2795_s29, 0 }
  0x83   : > { %s1203_s18 = sshll.u32 %s325_s6, 9  ;;  %s326_s14 = scalar_lea.sflag [#allocation7], %s325_s6 }
  0x84   : > { %s2014_s9 = scalar_lea.vmem [#allocation6], %s1203_s18 }
  0x85   : > { %1652 = dma.done.wait (%p2805_p5), %s326_s14, 8192  }
  0x86   : > { %1654 = vsyncadd (%p2805_p5), %s326_s14, 4294959104  ;;  %s1204_s20 = sshll.u32 %s325_s6, 7  ;;  %s370_s13 = sand.u32 1, %s1665_s16  }
  0x87   : > { %s1205_s12 = sshll.u32 %s370_s13, 4  ;;  %p379_p6 = scmp.lt.s32.totalorder %s1701_s25, 2 }
  0x88   : > { %s2031_s10 = scalar_lea.vmem [#allocation8], %s1204_s20  ;;  %s2033_s29 = scalar_lea.vmem [#allocation9], %s1205_s12 }
  0x89   : > { %s2025_s4 = scalar_select %p379_p6, %s1701_s25, 2 }
  0x8a   : > { %s2806_s30 = sld [smem:[#allocation17_spill]] }
  0x8b   : > { %s381_s21 = scalar_lea.vmem %s2764_s3, %s2025_s4 }
  0x90   : > { %p1206_p7 = scmp.ne.s32.totalorder %s2806_s30, 0 }
  0x91   : > { %v1720_v16 = vmov (!%p1206_p7), 0.0  }
  0x92   : > { %388 = sbr.rel (%p1206_p7) target bundleno = 153 (0x99), region = 71  ;;  %389 = vst [vmem:[#allocation2] sm:$0xff] (!%p1206_p7), %v1720_v16  ;;  %390 = vst [vmem:[#allocation2 + $0x8] sm:$0xff] (!%p1206_p7), %v1720_v16 }
  0x99 PF: > { %v391_v17 = vld [vmem:[%s2031_s10] sm:$0xff]  ;;  %v392_v18 = vld [vmem:[%s2031_s10 + $0x8] sm:$0xff]  ;;  %v393_v19 = vld [vmem:[%s2031_s10 + $0x10] sm:$0xff]  ;;  %v1721_v23 = vmov 0   ;;  %s2895_s5 = sld [smem:[#allocation17_spill]] }
  0x9a   : > { %v394_v20 = vld [vmem:[%s2031_s10 + $0x18] sm:$0xff]  ;;  %vm407_vm0 = vnez %v391_v17  ;;  %vm408_vm1 = vnez %v392_v18  ;;  %vm409_vm2 = vnez %v393_v19  ;;  %v2041_v21 = vld [vmem:[%s2014_s9 + $0x8] sm:$0xff]  ;;  %v2057_v33 = vld [vmem:[%s2014_s9] sm:$0xff] }
  0x9b   : > { %v2044_v22 = vld [vmem:[%s2014_s9 + $0x28] sm:$0xff]  ;;  %vm410_vm3 = vnez %v394_v20  ;;  %v487_v24 = vsel %vm407_vm0, 16843009, %v1721_v23  ;;  %v488_v25 = vsel %vm408_vm1, 16843009, %v1721_v23  ;;  %v2051_v31 = vld [vmem:[%s2014_s9 + $0x18] sm:$0xff] }
  0x9c   : > { %v489_v26 = vsel %vm409_vm2, 16843009, %v1721_v23  ;;  %v490_v27 = vsel %vm410_vm3, 16843009, %v1721_v23  ;;  %v503_v28 = vunpack.c.0.s8 %v487_v24  ;;  %v504_v29 = vunpack.c.0.s8 %v488_v25  ;;  %v2054_v32 = vld [vmem:[%s2014_s9 + $0x38] sm:$0xff]  ;;  %v2060_v38 = vld [vmem:[%s2014_s9 + $0x20] sm:$0xff] }
  0x9d   : > { %v505_v30 = vunpack.c.0.s8 %v489_v26  ;;  %v506_v34 = vunpack.c.0.s8 %v490_v27  ;;  %v507_v35 = vunpack.c.1.s8 %v487_v24  ;;  %v508_v36 = vunpack.c.1.s8 %v488_v25  ;;  %v2063_v39 = vld [vmem:[%s2014_s9 + $0x10] sm:$0xff]  ;;  %v2077_v50 = vld [vmem:[%s2014_s9 + $0x48] sm:$0xff]  ;;  %v2083_v59 = vld [vmem:[%s2014_s9 + $0x58] sm:$0xff] }
  0x9e   : > { %v509_v37 = vunpack.c.1.s8 %v489_v26  ;;  %v2066_v40 = vld [vmem:[%s2014_s9 + $0x30] sm:$0xff]  ;;  %v510_v41 = vunpack.c.1.s8 %v490_v27  ;;  %v567_v42 = vpack.c.b16 %v504_v29, %v503_v28  ;;  %v1280_v43 = vpack.c.bf16 %v2044_v22, %v2041_v21  ;;  %v2080_v51 = vld [vmem:[%s2014_s9 + $0x68] sm:$0xff]  ;;  %v2086_v60 = vld [vmem:[%s2014_s9 + $0x78] sm:$0xff] }
  0x9f   : > { %v1328_v44 = vpack.c.bf16 %v2054_v32, %v2051_v31  ;;  %v568_v45 = vpack.c.b16 %v506_v34, %v505_v30  ;;  %v570_v46 = vpack.c.b16 %v508_v36, %v507_v35  ;;  %v1283_v47 = vpack.c.bf16 %v2060_v38, %v2057_v33  ;;  %v2095_v11 = vld [vmem:[%s2014_s9 + $0x40] sm:$0xff]  ;;  %v2101_v17 = vld [vmem:[%s2014_s9 + $0x50] sm:$0xff]  ;;  %v398_v30 = vld [vmem:[%s2031_s10 + $0x38] sm:$0xff]  ;;  %p1271_p10 = scmp.ne.s32.totalorder %s2895_s5, 1 }
  0xa0   : > { %v1331_v48 = vpack.c.bf16 %v2066_v40, %v2063_v39  ;;  %v571_v49 = vpack.c.b16 %v510_v41, %v509_v37  ;;  %v511_v52 = vunpack.c.2.s8 %v487_v24  ;;  %v512_v53 = vunpack.c.2.s8 %v488_v25  ;;  %v2098_v16 = vld [vmem:[%s2014_s9 + $0x60] sm:$0xff]  ;;  %v2104_v18 = vld [vmem:[%s2014_s9 + $0x70] sm:$0xff]  ;;  %v2262_v19 = vld [vmem:[%s2014_s9 + $0xe8] sm:$0xff] }
  0xa1   : > { %v513_v54 = vunpack.c.2.s8 %v489_v26  ;;  %v569_v55 = vpack.c.b8 %v568_v45, %v567_v42  ;;  %v514_v56 = vunpack.c.2.s8 %v490_v27  ;;  %v515_v57 = vunpack.c.3.s8 %v487_v24  ;;  %v395_v24 = vld [vmem:[%s2031_s10 + $0x20] sm:$0xff]  ;;  %v2269_v28 = vld [vmem:[%s2014_s9 + $0xd8] sm:$0xff]  ;;  %v2289_v40 = vld [vmem:[%s2014_s9 + $0xd0] sm:$0xff] }
  0xa2   : > { %v516_v58 = vunpack.c.3.s8 %v488_v25  ;;  %v572_v61 = vpack.c.b8 %v571_v49, %v570_v46  ;;  %v517_v62 = vunpack.c.3.s8 %v489_v26  ;;  %v518_v63 = vunpack.c.3.s8 %v490_v27  ;;  %v396_v25 = vld [vmem:[%s2031_s10 + $0x28] sm:$0xff]  ;;  %v397_v26 = vld [vmem:[%s2031_s10 + $0x30] sm:$0xff]  ;;  %v2286_v39 = vld [vmem:[%s2014_s9 + $0xe0] sm:$0xff] }
  0xa3   : > { %v573_v0 = vpack.c.b16 %v512_v53, %v511_v52  ;;  %vm615_vm4 = vnez %v569_v55  ;;  %v574_v1 = vpack.c.b16 %v514_v56, %v513_v54  ;;  %v1286_v3 = vpack.c.bf16 %v2080_v51, %v2077_v50  ;;  %v2175_v54 = vld [vmem:[%s2014_s9 + $0x88] sm:$0xff]  ;;  %v2192_v56 = vld [vmem:[%s2014_s9 + $0xb8] sm:$0xff] }
  0xa4   : > { %v576_v2 = vpack.c.b16 %v516_v58, %v515_v57  ;;  %vm616_vm5 = vnez %v572_v61  ;;  %v631_v4 = vsel %vm615_vm4, 16843009, %v1721_v23  ;;  %v577_v5 = vpack.c.b16 %v518_v63, %v517_v62  ;;  %v2178_v55 = vld [vmem:[%s2014_s9 + $0xa8] sm:$0xff]  ;;  %v2211_v63 = vld [vmem:[%s2014_s9 + $0x80] sm:$0xff]  ;;  %v2292_v57 = vld [vmem:[%s2014_s9 + $0xf0] sm:$0xff] }
  0xa5   : > { %v1334_v6 = vpack.c.bf16 %v2086_v60, %v2083_v59  ;;  %v632_v7 = vsel %vm616_vm5, 16843009, %v1721_v23  ;;  %v648_v8 = vunpack.c.1.s8 %v631_v4  ;;  %v650_v9 = vunpack.c.3.s8 %v631_v4  ;;  %v2453_v58 = vld [vmem:[%s2014_s9 + $0x168] sm:$0xff] }
  0xa6   : > { %v647_v10 = vunpack.c.0.s8 %v631_v4  ;;  %v652_v12 = vunpack.c.1.s8 %v632_v7  ;;  %v654_v13 = vunpack.c.3.s8 %v632_v7  ;;  %v651_v14 = vunpack.c.0.s8 %v632_v7 }
  0xa7   : > { %v649_v15 = vunpack.c.2.s8 %v631_v4  ;;  %vm2106_vm6 = vcmp.ne.s32.totalorder %v648_v8, 0  ;;  %vm2110_vm7 = vcmp.ne.s32.totalorder %v650_v9, 0  ;;  %v653_v22 = vunpack.c.2.s8 %v632_v7  ;;  %v2230_v7 = vld [vmem:[%s2014_s9 + $0x90] sm:$0xff] }
  0xa8   : > { %vm2114_vm8 = vcmp.ne.s32.totalorder %v647_v10, 0  ;;  %vm716_vm9 = vcmp.ne.s32.totalorder %v652_v12, 0  ;;  %vm2121_vm10 = vcmp.ne.s32.totalorder %v654_v13, 0  ;;  %vm2125_vm11 = vcmp.ne.s32.totalorder %v651_v14, 0  ;;  %v2233_v8 = vld [vmem:[%s2014_s9 + $0xb0] sm:$0xff] }
  0xa9   : > { %vm2129_vm12 = vcmp.ne.s32.totalorder %v649_v15, 0  ;;  %vm1281_vm13 = vmpackc.low %vm716_vm9, %vm2106_vm6  ;;  %vm2136_vm14 = vcmp.ne.s32.totalorder %v653_v22, 0  ;;  %v575_v35 = vpack.c.b8 %v574_v1, %v573_v0  ;;  %v578_v36 = vpack.c.b8 %v577_v5, %v576_v2  ;;  %v2214_v0 = vld [vmem:[%s2014_s9 + $0xa0] sm:$0xff] }
  0xaa   : > { %v1289_v37 = vpack.c.bf16 %v2098_v16, %v2095_v11  ;;  %1282 = vmatprep.subr.msk.bf16.mxu0 %vm1281_vm13, %v1280_v43  ;;  %vm1329_vm15 = vmpackc.low %vm2121_vm10, %vm2110_vm7  ;;  %v1337_v41 = vpack.c.bf16 %v2104_v18, %v2101_v17  ;;  %vm411_vm0 = vnez %v395_v24  ;;  %vm412_vm1 = vnez %v396_v25  ;;  %v2259_v16 = vld [vmem:[%s2014_s9 + $0xc8] sm:$0xff]  ;;  %v2272_v17 = vld [vmem:[%s2014_s9 + $0xf8] sm:$0xff] }
  0xab   : > { %vm413_vm2 = vnez %v397_v26  ;;  %1330 = vmatprep.subr.msk.bf16.mxu1 %vm1329_vm15, %v1328_v44  ;;  %vm1284_vm3 = vmpackc.low %vm2125_vm11, %vm2114_vm8  ;;  %vm617_vm4 = vnez %v575_v35  ;;  %vm618_vm5 = vnez %v578_v36  ;;  %vm414_vm6 = vnez %v398_v30 }
  0xac   : > { %v2156_v42 = vsel %vm411_vm0, 16843009, %v1721_v23  ;;  %1285 = vmatpush1.bf16.xpose.msk.msra.mxu0 %vm1284_vm3, %v1283_v47  ;;  %vm1332_vm7 = vmpackc.low %vm2136_vm14, %vm2129_vm12  ;;  %v633_v31 = vsel %vm617_vm4, 16843009, %v1721_v23  ;;  %v634_v32 = vsel %vm618_vm5, 16843009, %v1721_v23  ;;  %v1292_v60 = vpack.c.bf16 %v2178_v55, %v2175_v54 }
  0xad   : > { %v2168_v43 = vsel %vm412_vm1, 16843009, %v1721_v23  ;;  %v519_v44 = vunpack.c.0.s8 %v2156_v42  ;;  %1333 = vmatpush1.bf16.xpose.msk.msra.mxu1 %vm1332_vm7, %v1331_v48  ;;  %v656_v33 = vunpack.c.1.s8 %v633_v31  ;;  %v660_v38 = vunpack.c.1.s8 %v634_v32  ;;  %v2189_v48 = vld [vmem:[%s2014_s9 + $0x98] sm:$0xff] }
  0xae   : > { %v658_v45 = vunpack.c.3.s8 %v633_v31  ;;  %v662_v46 = vunpack.c.3.s8 %v634_v32  ;;  %v655_v47 = vunpack.c.0.s8 %v633_v31  ;;  %v659_v49 = vunpack.c.0.s8 %v634_v32 }
  0xaf   : > { %v657_v52 = vunpack.c.2.s8 %v633_v31  ;;  %v661_v53 = vunpack.c.2.s8 %v634_v32  ;;  %vm720_vm8 = vcmp.ne.s32.totalorder %v656_v33, 0  ;;  %vm724_vm9 = vcmp.ne.s32.totalorder %v660_v38, 0 }
  0xb0   : > { %vm2180_vm10 = vcmp.ne.s32.totalorder %v658_v45, 0  ;;  %vm2184_vm11 = vcmp.ne.s32.totalorder %v662_v46, 0  ;;  %vm1287_vm12 = vmpackc.low %vm724_vm9, %vm720_vm8  ;;  %vm2194_vm13 = vcmp.ne.s32.totalorder %v655_v47, 0  ;;  %vm2198_vm14 = vcmp.ne.s32.totalorder %v659_v49, 0  ;;  %v2283_v46 = vld [vmem:[%s2014_s9 + $0xc0] sm:$0xff] }
  0xb1   : > { %vm2202_vm15 = vcmp.ne.s32.totalorder %v657_v52, 0  ;;  %vm2206_vm0 = vcmp.ne.s32.totalorder %v661_v53, 0  ;;  %1288 = vmatprep.subr.msk.bf16.mxu0 %vm1287_vm12, %v1286_v3  ;;  %vm1335_vm1 = vmpackc.low %vm2184_vm11, %vm2180_vm10  ;;  %v493_v1 = vsel %vm413_vm2, 16843009, %v1721_v23  ;;  %v494_v2 = vsel %vm414_vm6, 16843009, %v1721_v23 }
  0xb2   : > { %v520_v4 = vunpack.c.0.s8 %v2168_v43  ;;  %v523_v5 = vunpack.c.1.s8 %v2156_v42  ;;  %1336 = vmatprep.subr.msk.bf16.mxu1 %vm1335_vm1, %v1334_v6  ;;  %vm1290_vm2 = vmpackc.low %vm2198_vm14, %vm2194_vm13  ;;  %v521_v50 = vunpack.c.0.s8 %v493_v1  ;;  %v522_v51 = vunpack.c.0.s8 %v494_v2 }
  0xb3   : > { %v524_v3 = vunpack.c.1.s8 %v2168_v43  ;;  %v525_v9 = vunpack.c.1.s8 %v493_v1  ;;  %vm1338_vm3 = vmpackc.low %vm2206_vm0, %vm2202_vm15  ;;  %v526_v10 = vunpack.c.1.s8 %v494_v2  ;;  %v1340_v6 = vpack.c.bf16 %v2192_v56, %v2189_v48 }
  0xb4   : > { %v579_v59 = vpack.c.b16 %v520_v4, %v519_v44  ;;  %1291 = vmatpush1.bf16.xpose.msk.msra.mxu0 %vm1290_vm2, %v1289_v37  ;;  %v580_v11 = vpack.c.b16 %v522_v51, %v521_v50  ;;  %v1295_v13 = vpack.c.bf16 %v2214_v0, %v2211_v63  ;;  %v1343_v14 = vpack.c.bf16 %v2233_v8, %v2230_v7  ;;  %v400_v4 = vld [vmem:[%s2031_s10 + $0x48] sm:$0xff]  ;;  %v2460_v51 = vld [vmem:[%s2014_s9 + $0x158] sm:$0xff] }
  0xb5   : > { %v582_v12 = vpack.c.b16 %v524_v3, %v523_v5  ;;  %1339 = vmatpush1.bf16.xpose.msk.msra.mxu1 %vm1338_vm3, %v1337_v41  ;;  %v583_v15 = vpack.c.b16 %v526_v10, %v525_v9  ;;  %v527_v20 = vunpack.c.2.s8 %v2156_v42  ;;  %v528_v21 = vunpack.c.2.s8 %v2168_v43  ;;  %v842_v41 = vld [vmem:[%s2007_s23 + $0x8] sm:$0xff]  ;;  %v401_v5 = vld [vmem:[%s2031_s10 + $0x50] sm:$0xff]  ;;  %v402_v9 = vld [vmem:[%s2031_s10 + $0x58] sm:$0xff] }
  0xb6   : > { %v529_v22 = vunpack.c.2.s8 %v493_v1  ;;  %v581_v24 = vpack.c.b8 %v580_v11, %v579_v59  ;;  %v530_v25 = vunpack.c.2.s8 %v494_v2  ;;  %v531_v26 = vunpack.c.3.s8 %v2156_v42  ;;  %913 = vmatprep.mubr.f32.mxu0 %v842_v41 }
  0xb7   : > { %v532_v27 = vunpack.c.3.s8 %v2168_v43  ;;  %v584_v18 = vpack.c.b8 %v583_v15, %v582_v12  ;;  %v533_v29 = vunpack.c.3.s8 %v493_v1  ;;  %v534_v30 = vunpack.c.3.s8 %v494_v2  ;;  %v844_v43 = vld [vmem:[%s2007_s23 + $0x18] sm:$0xff]  ;;  %v399_v2 = vld [vmem:[%s2031_s10 + $0x40] sm:$0xff] }
  0xb8   : > { %v585_v34 = vpack.c.b16 %v528_v21, %v527_v20  ;;  %vm619_vm4 = vnez %v581_v24  ;;  %v586_v35 = vpack.c.b16 %v530_v25, %v529_v22  ;;  %v1298_v37 = vpack.c.bf16 %v2262_v19, %v2259_v16  ;;  %988 = vmatprep.mubr.f32.mxu1 %v844_v43  ;;  %v2366_v25 = vld [vmem:[%s2014_s9 + $0x108] sm:$0xff] }
  0xb9   : > { %v588_v36 = vpack.c.b16 %v532_v27, %v531_v26  ;;  %vm620_vm5 = vnez %v584_v18  ;;  %v635_v42 = vsel %vm619_vm4, 16843009, %v1721_v23  ;;  %v589_v31 = vpack.c.b16 %v534_v30, %v533_v29  ;;  %v2369_v26 = vld [vmem:[%s2014_s9 + $0x128] sm:$0xff]  ;;  %v2383_v27 = vld [vmem:[%s2014_s9 + $0x138] sm:$0xff]  ;;  %v403_v29 = vld [vmem:[%s2031_s10 + $0x60] sm:$0xff] }
  0xba   : > { %v1346_v32 = vpack.c.bf16 %v2272_v17, %v2269_v28  ;;  %v636_v44 = vsel %vm620_vm5, 16843009, %v1721_v23  ;;  %v664_v33 = vunpack.c.1.s8 %v635_v42  ;;  %v666_v38 = vunpack.c.3.s8 %v635_v42  ;;  %v404_v30 = vld [vmem:[%s2031_s10 + $0x68] sm:$0xff] }
  0xbb   : > { %v663_v45 = vunpack.c.0.s8 %v635_v42  ;;  %v668_v47 = vunpack.c.1.s8 %v636_v44  ;;  %v670_v49 = vunpack.c.3.s8 %v636_v44  ;;  %v667_v52 = vunpack.c.0.s8 %v636_v44 }
  0xbc   : > { %v665_v53 = vunpack.c.2.s8 %v635_v42  ;;  %vm2294_vm6 = vcmp.ne.s32.totalorder %v664_v33, 0  ;;  %vm2298_vm7 = vcmp.ne.s32.totalorder %v666_v38, 0  ;;  %v669_v1 = vunpack.c.2.s8 %v636_v44  ;;  %v2421_v44 = vld [vmem:[%s2014_s9 + $0x110] sm:$0xff] }
  0xbd   : > { %vm2302_vm8 = vcmp.ne.s32.totalorder %v663_v45, 0  ;;  %vm732_vm9 = vcmp.ne.s32.totalorder %v668_v47, 0  ;;  %vm2309_vm10 = vcmp.ne.s32.totalorder %v670_v49, 0  ;;  %vm2313_vm11 = vcmp.ne.s32.totalorder %v667_v52, 0  ;;  %v2424_v33 = vld [vmem:[%s2014_s9 + $0x130] sm:$0xff] }
  0xbe   : > { %vm2317_vm12 = vcmp.ne.s32.totalorder %v665_v53, 0  ;;  %vm1293_vm13 = vmpackc.low %vm732_vm9, %vm2294_vm6  ;;  %vm2324_vm14 = vcmp.ne.s32.totalorder %v669_v1, 0  ;;  %v587_v59 = vpack.c.b8 %v586_v35, %v585_v34  ;;  %v590_v11 = vpack.c.b8 %v589_v31, %v588_v36  ;;  %v2402_v35 = vld [vmem:[%s2014_s9 + $0x100] sm:$0xff]  ;;  %v405_v34 = vld [vmem:[%s2031_s10 + $0x70] sm:$0xff] }
  0xbf   : > { %v1301_v12 = vpack.c.bf16 %v2286_v39, %v2283_v46  ;;  %1294 = vmatprep.subr.msk.bf16.mxu0 %vm1293_vm13, %v1292_v60  ;;  %vm1341_vm15 = vmpackc.low %vm2309_vm10, %vm2298_vm7  ;;  %v1349_v15 = vpack.c.bf16 %v2292_v57, %v2289_v40  ;;  %vm415_vm0 = vnez %v399_v2  ;;  %vm416_vm1 = vnez %v400_v4  ;;  %v2405_v36 = vld [vmem:[%s2014_s9 + $0x120] sm:$0xff]  ;;  %v2450_v39 = vld [vmem:[%s2014_s9 + $0x148] sm:$0xff] }
  0xc0   : > { %vm417_vm2 = vnez %v401_v5  ;;  %1342 = vmatprep.subr.msk.bf16.mxu1 %vm1341_vm15, %v1340_v6  ;;  %vm1296_vm3 = vmpackc.low %vm2313_vm11, %vm2302_vm8  ;;  %vm621_vm4 = vnez %v587_v59  ;;  %vm622_vm5 = vnez %v590_v11  ;;  %vm418_vm6 = vnez %v402_v9  ;;  %v2463_v40 = vld [vmem:[%s2014_s9 + $0x178] sm:$0xff] }
  0xc1   : > { %v2347_v54 = vsel %vm415_vm0, 16843009, %v1721_v23  ;;  %1297 = vmatpush1.bf16.xpose.msk.msra.mxu0 %vm1296_vm3, %v1295_v13  ;;  %vm1344_vm7 = vmpackc.low %vm2324_vm14, %vm2317_vm12  ;;  %v637_v55 = vsel %vm621_vm4, 16843009, %v1721_v23  ;;  %v638_v48 = vsel %vm622_vm5, 16843009, %v1721_v23  ;;  %v1304_v17 = vpack.c.bf16 %v2369_v26, %v2366_v25 }
  0xc2   : > { %v2359_v56 = vsel %vm416_vm1, 16843009, %v1721_v23  ;;  %v535_v60 = vunpack.c.0.s8 %v2347_v54  ;;  %1345 = vmatpush1.bf16.xpose.msk.msra.mxu1 %vm1344_vm7, %v1343_v14  ;;  %v672_v63 = vunpack.c.1.s8 %v637_v55  ;;  %v676_v0 = vunpack.c.1.s8 %v638_v48  ;;  %v2380_v14 = vld [vmem:[%s2014_s9 + $0x118] sm:$0xff]  ;;  %v2481_v25 = vld [vmem:[%s2014_s9 + $0x170] sm:$0xff] }
  0xc3   : > { %v674_v6 = vunpack.c.3.s8 %v637_v55  ;;  %v678_v13 = vunpack.c.3.s8 %v638_v48  ;;  %v671_v20 = vunpack.c.0.s8 %v637_v55  ;;  %v675_v21 = vunpack.c.0.s8 %v638_v48 }
  0xc4   : > { %v673_v22 = vunpack.c.2.s8 %v637_v55  ;;  %v677_v24 = vunpack.c.2.s8 %v638_v48  ;;  %vm736_vm8 = vcmp.ne.s32.totalorder %v672_v63, 0  ;;  %vm740_vm9 = vcmp.ne.s32.totalorder %v676_v0, 0  ;;  %v2472_v0 = vld [vmem:[%s2014_s9 + $0x140] sm:$0xff] }
  0xc5   : > { %vm2371_vm10 = vcmp.ne.s32.totalorder %v674_v6, 0  ;;  %vm2375_vm11 = vcmp.ne.s32.totalorder %v678_v13, 0  ;;  %vm1299_vm12 = vmpackc.low %vm740_vm9, %vm736_vm8  ;;  %vm2385_vm13 = vcmp.ne.s32.totalorder %v671_v20, 0  ;;  %vm2389_vm14 = vcmp.ne.s32.totalorder %v675_v21, 0 }
  0xc6   : > { %vm2393_vm15 = vcmp.ne.s32.totalorder %v673_v22, 0  ;;  %vm2397_vm0 = vcmp.ne.s32.totalorder %v677_v24, 0  ;;  %1300 = vmatprep.subr.msk.bf16.mxu0 %vm1299_vm12, %v1298_v37  ;;  %vm1347_vm1 = vmpackc.low %vm2375_vm11, %vm2371_vm10  ;;  %v497_v41 = vsel %vm417_vm2, 16843009, %v1721_v23  ;;  %v498_v42 = vsel %vm418_vm6, 16843009, %v1721_v23 }
  0xc7   : > { %v536_v31 = vunpack.c.0.s8 %v2359_v56  ;;  %v539_v43 = vunpack.c.1.s8 %v2347_v54  ;;  %1348 = vmatprep.subr.msk.bf16.mxu1 %vm1347_vm1, %v1346_v32  ;;  %vm1302_vm2 = vmpackc.low %vm2389_vm14, %vm2385_vm13  ;;  %v537_v16 = vunpack.c.0.s8 %v497_v41  ;;  %v538_v19 = vunpack.c.0.s8 %v498_v42  ;;  %v2475_v22 = vld [vmem:[%s2014_s9 + $0x160] sm:$0xff]  ;;  %v2478_v24 = vld [vmem:[%s2014_s9 + $0x150] sm:$0xff] }
  0xc8   : > { %v540_v37 = vunpack.c.1.s8 %v2359_v56  ;;  %v541_v38 = vunpack.c.1.s8 %v497_v41  ;;  %vm1350_vm3 = vmpackc.low %vm2397_vm0, %vm2393_vm15  ;;  %v542_v45 = vunpack.c.1.s8 %v498_v42  ;;  %v1352_v32 = vpack.c.bf16 %v2383_v27, %v2380_v14 }
  0xc9   : > { %v591_v28 = vpack.c.b16 %v536_v31, %v535_v60  ;;  %1303 = vmatpush1.bf16.xpose.msk.msra.mxu0 %vm1302_vm2, %v1301_v12  ;;  %v592_v46 = vpack.c.b16 %v538_v19, %v537_v16  ;;  %v1307_v49 = vpack.c.bf16 %v2405_v36, %v2402_v35  ;;  %v1355_v52 = vpack.c.bf16 %v2424_v33, %v2421_v44 }
  0xca   : > { %v594_v47 = vpack.c.b16 %v540_v37, %v539_v43  ;;  %1351 = vmatpush1.bf16.xpose.msk.msra.mxu1 %vm1350_vm3, %v1349_v15  ;;  %v595_v53 = vpack.c.b16 %v542_v45, %v541_v38  ;;  %v543_v61 = vunpack.c.2.s8 %v2347_v54  ;;  %v544_v62 = vunpack.c.2.s8 %v2359_v56  ;;  %v406_v43 = vld [vmem:[%s2031_s10 + $0x78] sm:$0xff] }
  0xcb   : > { %v545_v1 = vunpack.c.2.s8 %v497_v41  ;;  %v593_v2 = vpack.c.b8 %v592_v46, %v591_v28  ;;  %v546_v4 = vunpack.c.2.s8 %v498_v42  ;;  %v547_v5 = vunpack.c.3.s8 %v2347_v54 }
  0xcc   : > { %v548_v50 = vunpack.c.3.s8 %v2359_v56  ;;  %v596_v57 = vpack.c.b8 %v595_v53, %v594_v47  ;;  %v549_v3 = vunpack.c.3.s8 %v497_v41  ;;  %v550_v9 = vunpack.c.3.s8 %v498_v42  ;;  %v477_v41 = vld [vmem:[%s2014_s9 + $0x1b0] sm:$0xff] }
  0xcd   : > { %v597_v10 = vpack.c.b16 %v544_v62, %v543_v61  ;;  %vm623_vm4 = vnez %v593_v2  ;;  %v598_v59 = vpack.c.b16 %v546_v4, %v545_v1  ;;  %v1310_v12 = vpack.c.bf16 %v2453_v58, %v2450_v39  ;;  %v2577_v4 = vld [vmem:[%s2014_s9 + $0x188] sm:$0xff]  ;;  %v483_v2 = vld [vmem:[%s2014_s9 + $0x1e0] sm:$0xff] }
  0xce   : > { %v600_v11 = vpack.c.b16 %v548_v50, %v547_v5  ;;  %vm624_vm5 = vnez %v596_v57  ;;  %v639_v15 = vsel %vm623_vm4, 16843009, %v1721_v23  ;;  %v601_v54 = vpack.c.b16 %v550_v9, %v549_v3  ;;  %v2580_v5 = vld [vmem:[%s2014_s9 + $0x1a8] sm:$0xff] }
  0xcf   : > { %v1358_v55 = vpack.c.bf16 %v2463_v40, %v2460_v51  ;;  %v640_v48 = vsel %vm624_vm5, 16843009, %v1721_v23  ;;  %v680_v56 = vunpack.c.1.s8 %v639_v15  ;;  %v682_v60 = vunpack.c.3.s8 %v639_v15 }
  0xd0   : > { %v679_v63 = vunpack.c.0.s8 %v639_v15  ;;  %v684_v6 = vunpack.c.1.s8 %v640_v48  ;;  %v686_v13 = vunpack.c.3.s8 %v640_v48  ;;  %v683_v20 = vunpack.c.0.s8 %v640_v48 }
  0xd1   : > { %v681_v21 = vunpack.c.2.s8 %v639_v15  ;;  %vm2483_vm6 = vcmp.ne.s32.totalorder %v680_v56, 0  ;;  %vm2487_vm7 = vcmp.ne.s32.totalorder %v682_v60, 0  ;;  %v685_v18 = vunpack.c.2.s8 %v640_v48  ;;  %v471_v56 = vld [vmem:[%s2014_s9 + $0x180] sm:$0xff] }
  0xd2   : > { %vm2491_vm8 = vcmp.ne.s32.totalorder %v679_v63, 0  ;;  %vm748_vm9 = vcmp.ne.s32.totalorder %v684_v6, 0  ;;  %vm2498_vm10 = vcmp.ne.s32.totalorder %v686_v13, 0  ;;  %vm2502_vm11 = vcmp.ne.s32.totalorder %v683_v20, 0  ;;  %v475_v60 = vld [vmem:[%s2014_s9 + $0x1a0] sm:$0xff] }
  0xd3   : > { %vm2506_vm12 = vcmp.ne.s32.totalorder %v681_v21, 0  ;;  %vm1305_vm13 = vmpackc.low %vm748_vm9, %vm2483_vm6  ;;  %vm2513_vm14 = vcmp.ne.s32.totalorder %v685_v18, 0  ;;  %v599_v19 = vpack.c.b8 %v598_v59, %v597_v10  ;;  %v602_v37 = vpack.c.b8 %v601_v54, %v600_v11  ;;  %v474_v54 = vld [vmem:[%s2014_s9 + $0x198] sm:$0xff] }
  0xd4   : > { %v1313_v38 = vpack.c.bf16 %v2475_v22, %v2472_v0  ;;  %1306 = vmatprep.subr.msk.bf16.mxu0 %vm1305_vm13, %v1304_v17  ;;  %vm1353_vm15 = vmpackc.low %vm2498_vm10, %vm2487_vm7  ;;  %v1361_v45 = vpack.c.bf16 %v2481_v25, %v2478_v24  ;;  %vm419_vm0 = vnez %v403_v29  ;;  %vm420_vm1 = vnez %v404_v30 }
  0xd5   : > { %vm421_vm2 = vnez %v405_v34  ;;  %1354 = vmatprep.subr.msk.bf16.mxu1 %vm1353_vm15, %v1352_v32  ;;  %vm1308_vm3 = vmpackc.low %vm2502_vm11, %vm2491_vm8  ;;  %vm625_vm4 = vnez %v599_v19  ;;  %vm626_vm5 = vnez %v602_v37  ;;  %vm422_vm6 = vnez %v406_v43  ;;  %v473_v34 = vld [vmem:[%s2014_s9 + $0x190] sm:$0xff] }
  0xd6   : > { %v2533_v28 = vsel %vm419_vm0, 16843009, %v1721_v23  ;;  %1309 = vmatpush1.bf16.xpose.msk.msra.mxu0 %vm1308_vm3, %v1307_v49  ;;  %vm1356_vm7 = vmpackc.low %vm2513_vm14, %vm2506_vm12  ;;  %v641_v14 = vsel %vm625_vm4, 16843009, %v1721_v23  ;;  %v642_v27 = vsel %vm626_vm5, 16843009, %v1721_v23  ;;  %v1316_v15 = vpack.c.bf16 %v2580_v5, %v2577_v4 }
  0xd7   : > { %v2545_v17 = vsel %vm420_vm1, 16843009, %v1721_v23  ;;  %v551_v32 = vunpack.c.0.s8 %v2533_v28  ;;  %1357 = vmatpush1.bf16.xpose.msk.msra.mxu1 %vm1356_vm7, %v1355_v52  ;;  %v688_v35 = vunpack.c.1.s8 %v641_v14  ;;  %v692_v36 = vunpack.c.1.s8 %v642_v27  ;;  %v479_v52 = vld [vmem:[%s2014_s9 + $0x1c0] sm:$0xff] }
  0xd8   : > { %v690_v46 = vunpack.c.3.s8 %v641_v14  ;;  %v694_v47 = vunpack.c.3.s8 %v642_v27  ;;  %v687_v49 = vunpack.c.0.s8 %v641_v14  ;;  %v691_v53 = vunpack.c.0.s8 %v642_v27 }
  0xd9   : > { %v689_v61 = vunpack.c.2.s8 %v641_v14  ;;  %v693_v62 = vunpack.c.2.s8 %v642_v27  ;;  %vm752_vm8 = vcmp.ne.s32.totalorder %v688_v35, 0  ;;  %vm756_vm9 = vcmp.ne.s32.totalorder %v692_v36, 0  ;;  %v480_v36 = vld [vmem:[%s2014_s9 + $0x1c8] sm:$0xff] }
  0xda   : > { %vm2551_vm10 = vcmp.ne.s32.totalorder %v690_v46, 0  ;;  %vm758_vm11 = vcmp.ne.s32.totalorder %v694_v47, 0  ;;  %vm1311_vm12 = vmpackc.low %vm756_vm9, %vm752_vm8  ;;  %vm2555_vm13 = vcmp.ne.s32.totalorder %v687_v49, 0  ;;  %vm2559_vm14 = vcmp.ne.s32.totalorder %v691_v53, 0  ;;  %v484_v46 = vld [vmem:[%s2014_s9 + $0x1e8] sm:$0xff]  ;;  %v482_v53 = vld [vmem:[%s2014_s9 + $0x1d8] sm:$0xff] }
  0xdb   : > { %vm2563_vm15 = vcmp.ne.s32.totalorder %v689_v61, 0  ;;  %vm2567_vm0 = vcmp.ne.s32.totalorder %v693_v62, 0  ;;  %1312 = vmatprep.subr.msk.bf16.mxu0 %vm1311_vm12, %v1310_v12  ;;  %vm1359_vm1 = vmpackc.low %vm758_vm11, %vm2551_vm10  ;;  %v501_v50 = vsel %vm421_vm2, 16843009, %v1721_v23  ;;  %v502_v57 = vsel %vm422_vm6, 16843009, %v1721_v23 }
  0xdc   : > { %v552_v3 = vunpack.c.0.s8 %v2545_v17  ;;  %v555_v39 = vunpack.c.1.s8 %v2533_v28  ;;  %1360 = vmatprep.subr.msk.bf16.mxu1 %vm1359_vm1, %v1358_v55  ;;  %vm1314_vm3 = vmpackc.low %vm2559_vm14, %vm2555_vm13  ;;  %v553_v58 = vunpack.c.0.s8 %v501_v50  ;;  %v554_v9 = vunpack.c.0.s8 %v502_v57  ;;  %v478_v55 = vld [vmem:[%s2014_s9 + $0x1b8] sm:$0xff] }
  0xdd   : > { %v556_v10 = vunpack.c.1.s8 %v2545_v17  ;;  %v557_v59 = vunpack.c.1.s8 %v501_v50  ;;  %vm1362_vm2 = vmpackc.low %vm2567_vm0, %vm2563_vm15  ;;  %v558_v11 = vunpack.c.1.s8 %v502_v57  ;;  %v559_v63 = vunpack.c.2.s8 %v2533_v28  ;;  %v486_v61 = vld [vmem:[%s2014_s9 + $0x1f8] sm:$0xff] }
  0xde   : > { %v603_v51 = vpack.c.b16 %v552_v3, %v551_v32  ;;  %1315 = vmatpush1.bf16.xpose.msk.msra.mxu0 %vm1314_vm3, %v1313_v38  ;;  %v604_v40 = vpack.c.b16 %v554_v9, %v553_v58  ;;  %v560_v0 = vunpack.c.2.s8 %v2545_v17  ;;  %v561_v6 = vunpack.c.2.s8 %v501_v50 }
  0xdf   : > { %v606_v12 = vpack.c.b16 %v556_v10, %v555_v39  ;;  %1363 = vmatpush1.bf16.xpose.msk.msra.mxu1 %vm1362_vm2, %v1361_v45  ;;  %v607_v48 = vpack.c.b16 %v558_v11, %v557_v59  ;;  %v562_v20 = vunpack.c.2.s8 %v502_v57  ;;  %v563_v21 = vunpack.c.3.s8 %v2533_v28 }
  0xe0   : > { %v605_v13 = vpack.c.b8 %v604_v40, %v603_v51  ;;  %v564_v22 = vunpack.c.3.s8 %v2545_v17  ;;  %v1364_v25 = vpack.c.bf16 %v478_v55, %v474_v54  ;;  %v565_v26 = vunpack.c.3.s8 %v501_v50  ;;  %v481_v51 = vld [vmem:[%s2014_s9 + $0x1d0] sm:$0xff]  ;;  %v841_v54 = vld [vmem:[%s2007_s23] sm:$0xff] }
  0xe1   : > { %v608_v24 = vpack.c.b8 %v607_v48, %v606_v12  ;;  %v566_v7 = vunpack.c.3.s8 %v502_v57  ;;  %v1319_v8 = vpack.c.bf16 %v475_v60, %v471_v56  ;;  %v609_v18 = vpack.c.b16 %v560_v0, %v559_v63  ;;  %v485_v40 = vld [vmem:[%s2014_s9 + $0x1f0] sm:$0xff]  ;;  %v846_v48 = vld [vmem:[%s2007_s23 + $0x28] sm:$0xff]  ;;  %v848_v56 = vld [vmem:[%s2007_s23 + $0x38] sm:$0xff] }
  0xe2   : > { %vm627_vm4 = vnez %v605_v13  ;;  %v610_v29 = vpack.c.b16 %v562_v20, %v561_v6  ;;  %v612_v42 = vpack.c.b16 %v564_v22, %v563_v21  ;;  %v1367_v35 = vpack.c.bf16 %v477_v41, %v473_v34  ;;  %v843_v55 = vld [vmem:[%s2007_s23 + $0x10] sm:$0xff]  ;;  %v845_v60 = vld [vmem:[%s2007_s23 + $0x20] sm:$0xff] }
  0xe3   : > { %vm628_vm5 = vnez %v608_v24  ;;  %v643_v30 = vsel %vm627_vm4, 16843009, %v1721_v23  ;;  %v613_v31 = vpack.c.b16 %v566_v7, %v565_v26  ;;  %v1322_v4 = vpack.c.bf16 %v484_v46, %v480_v36  ;;  %v847_v63 = vld [vmem:[%s2007_s23 + $0x30] sm:$0xff]  ;;  %v840_v26 = vld [vmem:[#allocation2 + $0x8] sm:$0xff] }
  0xe4   : > { %v644_v43 = vsel %vm628_vm5, 16843009, %v1721_v23  ;;  %v696_v16 = vunpack.c.1.s8 %v643_v30  ;;  %v698_v19 = vunpack.c.3.s8 %v643_v30  ;;  %v695_v37 = vunpack.c.0.s8 %v643_v30  ;;  %v839_v6 = vld [vmem:[#allocation2] sm:$0xff] }
  0xe5   : > { %v700_v38 = vunpack.c.1.s8 %v644_v43  ;;  %v702_v45 = vunpack.c.3.s8 %v644_v43  ;;  %v699_v28 = vunpack.c.0.s8 %v644_v43  ;;  %v697_v14 = vunpack.c.2.s8 %v643_v30  ;;  %v1272_v41 = vld [vmem:[%s381_s21] ss:$0 sm:$0xff] (!%p1271_p10) }
  0xe6   : > { %vm2614_vm6 = vcmp.ne.s32.totalorder %v696_v16, 0  ;;  %vm2618_vm7 = vcmp.ne.s32.totalorder %v698_v19, 0  ;;  %v701_v32 = vunpack.c.2.s8 %v644_v43  ;;  %vm2624_vm10 = vcmp.ne.s32.totalorder %v695_v37, 0 }
  0xe7   : > { %vm764_vm8 = vcmp.ne.s32.totalorder %v700_v38, 0  ;;  %vm766_vm9 = vcmp.ne.s32.totalorder %v702_v45, 0  ;;  %vm2628_vm11 = vcmp.ne.s32.totalorder %v699_v28, 0  ;;  %vm2636_vm13 = vcmp.ne.s32.totalorder %v697_v14, 0 }
  0xe8   : > { %vm1317_vm12 = vmpackc.low %vm764_vm8, %vm2614_vm6  ;;  %vm2640_vm14 = vcmp.ne.s32.totalorder %v701_v32, 0  ;;  %v611_v44 = vpack.c.b8 %v610_v29, %v609_v18  ;;  %v614_v33 = vpack.c.b8 %v613_v31, %v612_v42  ;;  %v1370_v57 = vpack.c.bf16 %v486_v61, %v482_v53 }
  0xe9   : > { %1318 = vmatprep.subr.msk.bf16.mxu0 %vm1317_vm12, %v1316_v15  ;;  %vm1365_vm15 = vmpackc.low %vm766_vm9, %vm2618_vm7  ;;  %v1325_v3 = vpack.c.bf16 %v483_v2, %v479_v52 }
  0xea   : > { %1366 = vmatprep.subr.msk.bf16.mxu1 %vm1365_vm15, %v1364_v25  ;;  %vm1320_vm0 = vmpackc.low %vm2628_vm11, %vm2624_vm10  ;;  %vm629_vm1 = vnez %v611_v44  ;;  %vm630_vm3 = vnez %v614_v33 }
  0xeb   : > { %1321 = vmatpush1.bf16.xpose.msk.msra.mxu0 %vm1320_vm0, %v1319_v8  ;;  %vm1368_vm2 = vmpackc.low %vm2640_vm14, %vm2636_vm13  ;;  %v645_v5 = vsel %vm629_vm1, 16843009, %v1721_v23  ;;  %v646_v50 = vsel %vm630_vm3, 16843009, %v1721_v23  ;;  %v1373_v23 = vpack.c.bf16 %v485_v40, %v481_v51 }
  0xec   : > { %1369 = vmatpush1.bf16.xpose.msk.msra.mxu1 %vm1368_vm2, %v1367_v35  ;;  %v704_v39 = vunpack.c.1.s8 %v645_v5  ;;  %v708_v58 = vunpack.c.1.s8 %v646_v50  ;;  %v706_v9 = vunpack.c.3.s8 %v645_v5  ;;  %v710_v10 = vunpack.c.3.s8 %v646_v50 }
  0xed   : > { %v703_v59 = vunpack.c.0.s8 %v645_v5  ;;  %v707_v11 = vunpack.c.0.s8 %v646_v50  ;;  %v705_v12 = vunpack.c.2.s8 %v645_v5  ;;  %v709_v15 = vunpack.c.2.s8 %v646_v50 }
  0xee   : > { %vm768_vm4 = vcmp.ne.s32.totalorder %v704_v39, 0  ;;  %vm772_vm5 = vcmp.ne.s32.totalorder %v708_v58, 0  ;;  %vm770_vm6 = vcmp.ne.s32.totalorder %v706_v9, 0  ;;  %vm774_vm7 = vcmp.ne.s32.totalorder %v710_v10, 0 }
  0xef   : > { %vm1323_vm8 = vmpackc.low %vm772_vm5, %vm768_vm4  ;;  %vm767_vm9 = vcmp.ne.s32.totalorder %v703_v59, 0  ;;  %vm771_vm10 = vcmp.ne.s32.totalorder %v707_v11, 0  ;;  %vm769_vm11 = vcmp.ne.s32.totalorder %v705_v12, 0  ;;  %vm773_vm12 = vcmp.ne.s32.totalorder %v709_v15, 0 }
  0xf0   : > { %1324 = vmatprep.subr.msk.bf16.mxu0 %vm1323_vm8, %v1322_v4  ;;  %vm1371_vm13 = vmpackc.low %vm774_vm7, %vm770_vm6 }
  0xf1   : > { %1372 = vmatprep.subr.msk.bf16.mxu1 %vm1371_vm13, %v1370_v57  ;;  %vm1326_vm14 = vmpackc.low %vm771_vm10, %vm767_vm9 }
  0xf2   : > { %vm1374_vm15 = vmpackc.low %vm773_vm12, %vm769_vm11 }
  0xf3   : > { %1327 = vmatpush1.bf16.xpose.msk.msra.mxu0 %vm1326_vm14, %v1325_v3 }
  0xf4   : > { %1375 = vmatpush1.bf16.xpose.msk.msra.mxu1 %vm1374_vm15, %v1373_v23 }
  0xfa   : > { %914 = vmatmul.mubr.f32.vlgmr.msra.gmra.mrb[0].mxu0 %v841_v54 }
  0xfb   : > { %989 = vmatmul.mubr.f32.vlgmr.msra.gmra.mrb[0].mxu1 %v843_v55  ;;  %918 = vmatprep.mubr.f32.mxu0 %v846_v48 }
  0xfc   : > { %993 = vmatprep.mubr.f32.mxu1 %v848_v56 }
  0xfe   : > { %919 = vmatmul.mubr.f32.gmra.mrb[2].mxu0 %v845_v60 }
  0xff   : > { %994 = vmatmul.mubr.f32.gmra.mrb[2].mxu1 %v847_v63 }
 0x1cd   : > { %v915_v0 = vpop.f32.mrb[0].mxu0 }
 0x1ce   : > { %v990_v13 = vpop.f32.mrb[0].mxu1  ;;  %v917_v20 = vpop.f32.mrb[1].mxu0 }
 0x1cf   : > { %v991_v21 = vadd.f32 %v990_v13, %v915_v0  ;;  %v992_v22 = vpop.f32.mrb[1].mxu1 }
 0x1d1   : > { %v999_v24 = vadd.f32 %v991_v21, %v839_v6  ;;  %v920_v25 = vpop.f32.mrb[2].mxu0  ;;  %1006 = sbr.rel (%p1271_p10) target bundleno = 482 (0x1e2), region = 75 }
 0x1d2   : > { %v995_v7 = vpop.f32.mrb[2].mxu1  ;;  %v922_v8 = vpop.f32.mrb[3].mxu0 }
 0x1d3   : > { %1001 = vst [vmem:[#allocation2] sm:$0xff] %v999_v24  ;;  %v996_v18 = vadd.f32 %v995_v7, %v920_v25  ;;  %v997_v29 = vpop.f32.mrb[3].mxu1 }
 0x1d5   : > { %v1000_v30 = vadd.f32 %v996_v18, %v840_v26 }
 0x1d7   : > { %1002 = vst [vmem:[#allocation2 + $0x8] sm:$0xff] %v1000_v30 }
 0x1da   : > { %v1007_v34 = vld [vmem:[#allocation2] sm:$0xff] }
 0x1db   : > { %v1016_v31 = vadd.f32 %v1272_v41, %v1007_v34 }
 0x1dd   : > { %1018 = vst [vmem:[%s2033_s29] sm:$0xff] %v1016_v31 }
 0x1de   : > { %v1008_v42 = vld [vmem:[#allocation2 + $0x8] sm:$0xff] }
 0x1df   : > { %v1017_v43 = vadd.f32 %v1272_v41, %v1008_v42 }
 0x1e1   : > { %1019 = vst [vmem:[%s2033_s29 + $0x8] sm:$0xff] %v1017_v43 }
 0x1e2 PF: > { %s2896_s24 = sld [smem:[#allocation23_spill]]  ;;  %s1274_s7 = sshll.u32 %s1701_s25, 7 }
 0x1e3   : > { %s2897_s6 = sld [smem:[#allocation26_spill]]  ;;  %s1036_s14 = sshll.u32 %s2033_s29, 4  ;;  %s2681_s14 = int_to_ptr.vmem [resolvable:$true] %s1036_s14 }
 0x1e4   : > { %s2685_s9 = scalar_lea.sflag [#allocation5], %s370_s13  ;;  %s1563_s20 = scalar_lea.vmem %s2681_s14, 256 }
 0x1e5   : > { %p1564_p11 = scmp.ne.s32.totalorder %s2681_s14, %s1563_s20  ;;  %s1722_s25 = smov [#allocation9]  }
 0x1e6   : > { %s1567_s12 = sshll.u32 %s1722_s25, 4  ;;  %s1568_s12 = int_to_ptr.vmem [resolvable:$false] %s1567_s12 }
 0x1e7   : > { %s1569_s4 = scalar_lea.vmem %s1568_s12, 512  ;;  %p1570_p8 = scmp.lt.s32.totalorder %s2681_s14, %s1568_s12 }
 0x1e8   : > { %p2898_p1 = scmp.ne.s32.totalorder %s2896_s24, 0  ;;  %p1571_p9 = scmp.lt.s32.totalorder %s1569_s4, %s1563_s20 }
 0x1e9   : > { %s2678_s18 = scalar_lea.hbm %s2897_s6, %s1274_s7 }
 0x1ea   : > { %p1565_p4 = pnand %p1564_p11, %p2898_p1  ;;  %p1572_p13 = por %p1571_p9, %p1570_p8 }
 0x1ec   : > { %p1566_p3 = pneg %p1565_p4 }
 0x1ee   : > { %p1573_p0 = pnand %p1572_p13, %p1566_p3 }
 0x1f0   : > { %1576 = shalt.err (!%p1573_p0)
}
 0x1f1   : > { %s1577_s13 = scalar_lea.hbm %s2678_s18, 256  ;;  %s1581_s21 = scalar_lea.hbm %s2897_s6, 768 }
 0x1f2   : > { %p1578_p2 = scmp.ne.s32.totalorder %s2678_s18, %s1577_s13  ;;  %p1582_p6 = scmp.lt.u32.totalorder %s2678_s18, %s2897_s6 }
 0x1f3   : > { %p1583_p7 = scmp.lt.u32.totalorder %s1581_s21, %s1577_s13  ;;  %p1585_p11 = scmp.lt.u32.totalorder %s1577_s13, %s2678_s18 }
 0x1f4   : > { %p1579_p12 = pnand %p1578_p2, %p2898_p1 }
 0x1f5   : > { %p1584_p10 = por %p1583_p7, %p1582_p6 }
 0x1f6   : > { %p1580_p5 = pneg %p1579_p12 }
 0x1f7   : > { %p1586_p4 = por %p1585_p11, %p1584_p10 }
 0x1f9   : > { %p1587_p3 = pnand %p1586_p4, %p1580_p5 }
 0x1fb   : > { %1590 = shalt.err (!%p1587_p3)
}
 0x1fc   : > { %s1723_s30 = smov 128   ;;  %s1724_s5 = smov 384  }
 0x1fd   : > { %s1725_s0 = smov 8  }
 0x1fe   : > { %1380 = dma.vmem_to_hbm [thread:$0]  (%p2898_p1), %s2681_s14, 256, %s2678_s18, %s2685_s9, %s1723_s30, %s1724_s5, %s1725_s0  }
 0x1ff PF: > { %s2899_s17 = sld [smem:[#allocation13_spill]]  ;;  %s2900_s7 = sld [smem:[#allocation24_spill]] }
 0x200   : > { %p1386_p8 = scmp.ge.s32.totalorder %s1713_s28, 2 }
 0x205   : > { %s1051_s15 = sand.u32 1, %s2899_s17   ;;  %p2901_p9 = scmp.ne.s32.totalorder %s2900_s7, 0 }
 0x206   : > { %s1052_s23 = scalar_lea.sflag [#allocation5], %s1051_s15 }
 0x207   : > { %p1383_p13 = pnand %p1386_p8, %p2901_p9 }
 0x209   : > { %1656 = dma.done.wait (!%p1383_p13), %s1052_s23, 256  }
 0x20a   : > { %1658 = vsyncadd (!%p1383_p13), %s1052_s23, 4294967040  ;;  %s23_s28 = sadd.s32 1, %s1713_s28   ;;  %s2903_s24 = sld [smem:[#allocation14_spill]] }
 0x20b   : > { %p2714_p0 = scmp.ge.s32.totalorder %s23_s28, 8   ;;  %s2904_s17 = sld [smem:[#allocation22_spill]] }
 0x20c   : > { %s2905_s14 = sld [smem:[#allocation15_spill]]  ;;  %s2906_s9 = sld [smem:[#allocation21_spill]] }
 0x20d   : > { %s2907_s25 = sld [smem:[#allocation16_spill]]  ;;  %s2908_s23 = sld [smem:[#allocation20_spill]] }
 0x20e   : > { %s2909_s12 = sld [smem:[#allocation18_spill]]  ;;  %s2910_s4 = sld [smem:[#allocation19_spill]] }
 0x20f   : > { %s2912_s15 = smov %s1665_s16  ;;  %s2914_s18 = smov %s1677_s19 }
 0x210   : > { %s2913_s16 = smov %s2903_s24  ;;  %s2917_s21 = smov %s1689_s22 }
 0x211   : > { %s2919_s24 = smov %s1705_s26  ;;  %22 = sbr.rel (!%p2714_p0) target bundleno = 15 (0xf), region = 136 }
 0x212   : > { %s2915_s19 = smov %s2905_s14  ;;  %s2916_s20 = smov %s2906_s9 }
 0x213   : > { %s2918_s22 = smov %s2907_s25  ;;  %s2920_s25 = smov %s1709_s27 }
 0x214   : > { %s2921_s26 = smov %s2909_s12  ;;  %s2922_s27 = smov %s2910_s4 }
 0x218   :  { %1057 = vsyncpa [#allocation4], 1 }
 0x219   :  { %1059 = vsyncpa [#allocation4 + $0x1], 1 }
 0x21a   :  { %1060 = vsyncpa [#allocation7], 1 }
 0x21b   :  { %1062 = vsyncpa [#allocation7 + $0x1], 1 }
 0x21c   :  { %1063 = vsyncpa [#allocation5], 1 }
 0x21d   :  { %1065 = vsyncpa [#allocation5 + $0x1], 1 }

</bundles_post_ra>
